<compile_context>
chip_gen: v6e
topology: v6e:2x2x1
jax: 0.10.0
libtpu: 0.0.40
codegen_flags: <defaults>
</compile_context>

<pallas_src>
import functools

import jax
import jax.numpy as jnp
from jax import lax
from jax.experimental import pallas as pl
from jax.experimental.pallas import tpu as pltpu


def _dc_ce_stats_kernel(x_ref, lab_ref, tp_ref, den_ref, ce_ref, *,
                        n_chunks, chunk_rows, unroll):
    """Accumulate dice/CE partial stats for one (batch, spatial-tile) block.

    x_ref  : (C, ts, 128) logits (any float dtype)
    lab_ref: (ts, 128) int32 label map
    tp_ref : (C, chunk_rows, 128) f32 partial sum of p*y           (per batch)
    den_ref: (C, chunk_rows, 128) f32 partial sum of p + y         (per batch)
    ce_ref : (chunk_rows, 128)   f32 partial sum of (lse - x[tgt]) (per batch)
    """
    C = x_ref.shape[0]
    n = pl.program_id(1)

    @pl.when(n == 0)
    def _init():
        tp_ref[...] = jnp.zeros_like(tp_ref)
        den_ref[...] = jnp.zeros_like(den_ref)
        ce_ref[...] = jnp.zeros_like(ce_ref)

    acc_shape = (chunk_rows, 128)

    def chunk_stats(base, tp_c, den_c, ce_c):
        lab = lab_ref[pl.ds(base, chunk_rows), :]
        xs = [x_ref[c, pl.ds(base, chunk_rows), :].astype(jnp.float32)
              for c in range(C)]
        # Channel softmax / logsumexp: pure elementwise VPU/EUP work on dense
        # (chunk_rows, 128) vregs; no cross-lane (XLU) ops in the hot loop.
        m = xs[0]
        for xc in xs[1:]:
            m = jnp.maximum(m, xc)
        es = [jnp.exp(xc - m) for xc in xs]
        s = es[0]
        for ec in es[1:]:
            s = s + ec
        inv_s = pl.reciprocal(s, approx=False)   # approx=True perturbs > tol
        lse = m + jnp.log(s)
        x_tgt = jnp.zeros(acc_shape, jnp.float32)
        tp_new, den_new = [], []
        for c in range(C):
            yc = (lab == c).astype(jnp.float32)   # one-hot slice for channel c
            pc = es[c] * inv_s                    # softmax prob for channel c
            tp_new.append(tp_c[c] + pc * yc)
            den_new.append(den_c[c] + (pc + yc))  # sum(p)+sum(y) == 2tp+fp+fn
            x_tgt = x_tgt + xs[c] * yc
        return tuple(tp_new), tuple(den_new), ce_c + (lse - x_tgt)

    def body(i, carry):
        tp_c, den_c, ce_c = carry
        base = pl.multiple_of(i * chunk_rows, chunk_rows)
        return chunk_stats(base, tp_c, den_c, ce_c)

    zeros = jnp.zeros(acc_shape, jnp.float32)
    init = (tuple(zeros for _ in range(C)),
            tuple(zeros for _ in range(C)),
            zeros)
    if n_chunks == 1:
        tp_c, den_c, ce_c = chunk_stats(0, *init)
    else:
        tp_c, den_c, ce_c = lax.fori_loop(0, n_chunks, body, init,
                                          unroll=unroll)

    # Single read-modify-write into the small per-batch accumulators per tile.
    for c in range(C):
        tp_ref[c, :, :] += tp_c[c]
        den_ref[c, :, :] += den_c[c]
    ce_ref[...] += ce_c


def _pick_chunk(ts):
    """Sublane chunk size: 8 when possible (matches accumulator rows)."""
    if ts % 8 == 0:
        return 8
    if ts <= 32:
        return ts
    for d in range(32, 0, -1):
        if ts % d == 0:
            return d
    return ts


def _pick_tile(hw128, max_ts):
    """Largest legal sublane tile dividing hw128, plus its inner chunk size."""
    if hw128 <= max_ts:
        ts = hw128
    else:
        ts = None
        for d in range(max_ts, 7, -1):
            if d % 8 == 0 and hw128 % d == 0:
                ts = d
                break
        if ts is None:
            ts = hw128          # degenerate fallback: whole row at once
    return ts, _pick_chunk(ts)


def dc_and_ce_loss(net_output, target, *, smooth=1e-5, weight_ce=1.0,
                   weight_dice=1.0, max_tile_sublanes=1024,
                   vmem_budget_bytes=12 * 1024 * 1024):
    """net_output: (B, C, H, W) logits; target: (B, 1, H, W) or (B, H, W)."""
    B, C, H, W = net_output.shape
    HW = H * W
    if HW % 128 != 0:
        raise ValueError(f"H*W must be a multiple of 128, got {HW}")
    hw128 = HW // 128

    lab = target
    if lab.ndim == 4:                       # (B, 1, H, W) -> (B, H, W)
        lab = lab[:, 0]
    lab = lab.reshape(B, hw128, 128).astype(jnp.int32)

    # Free reshape: no HBM transpose, no upcast (cast happens per-chunk in VMEM).
    x = net_output.reshape(B, C, hw128, 128)

    # Largest tile whose double-buffered inputs stay inside the VMEM budget.
    x_bytes = jnp.dtype(x.dtype).itemsize
    per_sublane = 2 * (C * 128 * x_bytes + 128 * 4)     # logits + labels, x2 bufs
    vmem_cap = max(8, (vmem_budget_bytes // per_sublane) // 8 * 8)
    ts, ch = _pick_tile(hw128, min(max_tile_sublanes, vmem_cap))
    n_chunks = ts // ch
    unroll = 2 if n_chunks > 1 else 1
    grid = (B, hw128 // ts)

    kernel = functools.partial(_dc_ce_stats_kernel, n_chunks=n_chunks,
                               chunk_rows=ch, unroll=unroll)

    tp_out, den_out, ce_out = pl.pallas_call(
        kernel,
        out_shape=(
            jax.ShapeDtypeStruct((B, C, ch, 128), jnp.float32),
            jax.ShapeDtypeStruct((B, C, ch, 128), jnp.float32),
            jax.ShapeDtypeStruct((B, ch, 128), jnp.float32),
        ),
        grid_spec=pltpu.PrefetchScalarGridSpec(
            num_scalar_prefetch=0,
            grid=grid,
            in_specs=[
                pl.BlockSpec((None, C, ts, 128), lambda b, n: (b, 0, n, 0)),
                pl.BlockSpec((None, ts, 128), lambda b, n: (b, n, 0)),
            ],
            out_specs=(
                pl.BlockSpec((None, C, ch, 128), lambda b, n: (b, 0, 0, 0)),
                pl.BlockSpec((None, C, ch, 128), lambda b, n: (b, 0, 0, 0)),
                pl.BlockSpec((None, ch, 128), lambda b, n: (b, 0, 0)),
            ),
        ),
        compiler_params=pltpu.CompilerParams(
            # Batch axis is independent (per-batch partial outputs) -> shard it
            # across TensorCores on v7x; spatial axis carries the resident
            # output accumulation and must stay sequential.
            dimension_semantics=("parallel", "arbitrary"),
            vmem_limit_bytes=32 * 1024 * 1024),
    )(x, lab)

    # Tiny finalize in plain JAX on the combined per-batch partials.
    tp = jnp.sum(tp_out, axis=(0, 2, 3))        # (C,)  sum p*y over batch+spatial
    den = jnp.sum(den_out, axis=(0, 2, 3))      # (C,)  == 2tp + fp + fn
    ce_loss = jnp.sum(ce_out) / float(B * HW)   # mean CE over all pixels
    dc = (2.0 * tp[1:] + smooth) / (den[1:] + smooth + 1e-8)   # do_bg=False
    dice_loss = -jnp.mean(dc)
    return weight_ce * ce_loss + weight_dice * dice_loss


def dc_and_ce_loss_ref(net_output, target, smooth=1e-5, weight_ce=1.0,
                       weight_dice=1.0):
    """Pure-JAX reference mirroring the PyTorch DC_and_CE_loss forward."""
    B, C, H, W = net_output.shape
    lab = target[:, 0] if target.ndim == 4 else target
    lab = lab.astype(jnp.int32)
    logits = net_output.astype(jnp.float32)

    # Cross entropy (mean over all pixels).
    logp = jax.nn.log_softmax(logits, axis=1)
    nll = -jnp.take_along_axis(logp, lab[:, None, :, :], axis=1)[:, 0]
    ce_loss = jnp.mean(nll)

    # Soft dice (softmax nonlin, batch_dice=True, do_bg=False).
    p = jax.nn.softmax(logits, axis=1)
    y1h = jax.nn.one_hot(lab, C, axis=1, dtype=jnp.float32)
    tp = jnp.sum(p * y1h, axis=(0, 2, 3))
    fp = jnp.sum(p * (1.0 - y1h), axis=(0, 2, 3))
    fn = jnp.sum((1.0 - p) * y1h, axis=(0, 2, 3))
    dc = (2.0 * tp + smooth) / (2.0 * tp + fp + fn + smooth + 1e-8)
    dice_loss = -jnp.mean(dc[1:])

    return weight_ce * ce_loss + weight_dice * dice_loss


if __name__ == "__main__":
    key = jax.random.PRNGKey(0)
    kx, ky = jax.random.split(key)
    B, C, H, W = 2, 4, 16, 16
    net_output = jax.random.normal(kx, (B, C, H, W), dtype=jnp.float32)   # logits
    target = jax.random.randint(ky, (B, 1, H, W), 0, C, dtype=jnp.int32)  # (b,1,h,w)

    loss = jax.block_until_ready(dc_and_ce_loss(net_output, target))
    ref = jax.block_until_ready(dc_and_ce_loss_ref(net_output, target))

    assert jnp.isfinite(loss), "kernel produced non-finite loss"
    assert jnp.allclose(loss, ref, atol=2e-5, rtol=2e-5), (loss, ref)
    print("KERNEL_OK")
</pallas_src>

<mosaic_0001>
module attributes {stable_mosaic.version = 11 : i64} {
  func.func @_dc_ce_stats_kernel(%arg0: i32, %arg1: i32, %arg2: memref<1x4x2x128xf32, #tpu.memory_space<vmem>>, %arg3: memref<1x2x128xi32, #tpu.memory_space<vmem>>, %arg4: memref<1x4x2x128xf32, #tpu.memory_space<vmem>>, %arg5: memref<1x4x2x128xf32, #tpu.memory_space<vmem>>, %arg6: memref<1x2x128xf32, #tpu.memory_space<vmem>>) attributes {dimension_semantics = [#tpu.dimension_semantics<parallel>, #tpu.dimension_semantics<arbitrary>], iteration_bounds = array<i64: 2, 1>, scalar_prefetch = 0 : i64, scratch_operands = 0 : i64, tpu.core_type = #tpu.core_type<tc>, window_params = [{transform_indices = @transform_0, window_bounds = array<i64: 1, 4, 2, 128>}, {transform_indices = @transform_1, window_bounds = array<i64: 1, 2, 128>}, {transform_indices = @transform_2, window_bounds = array<i64: 1, 4, 2, 128>}, {transform_indices = @transform_3, window_bounds = array<i64: 1, 4, 2, 128>}, {transform_indices = @transform_4, window_bounds = array<i64: 1, 2, 128>}]} {
    %c0_i32 = arith.constant 0 : i32
    %0 = arith.cmpi eq, %arg1, %c0_i32 : i32
    %1 = arith.extui %0 : i1 to i32
    %c0_i32_0 = arith.constant 0 : i32
    %2 = arith.cmpi ne, %1, %c0_i32_0 : i32
    scf.if %2 {
      %cst_88 = arith.constant 0.000000e+00 : f32
      %132 = vector.broadcast %cst_88 : f32 to vector<4x2x128xf32>
      %c0_89 = arith.constant 0 : index
      %c0_90 = arith.constant 0 : index
      %c0_91 = arith.constant 0 : index
      %c0_92 = arith.constant 0 : index
      %133 = vector.load %arg4[%c0_89, %c0_90, %c0_91, %c0_92] : memref<1x4x2x128xf32, #tpu.memory_space<vmem>>, vector<1x4x2x128xf32>
      %134 = vector.shape_cast %133 : vector<1x4x2x128xf32> to vector<4x2x128xf32>
      %135 = vector.shape_cast %132 : vector<4x2x128xf32> to vector<1x4x2x128xf32>
      tpu.vector_store %arg4[%c0_89, %c0_90, %c0_91, %c0_92], %135 {strides = array<i32>} : memref<1x4x2x128xf32, #tpu.memory_space<vmem>>, vector<1x4x2x128xf32>,
      %cst_93 = arith.constant 0.000000e+00 : f32
      %136 = vector.broadcast %cst_93 : f32 to vector<4x2x128xf32>
      %c0_94 = arith.constant 0 : index
      %c0_95 = arith.constant 0 : index
      %c0_96 = arith.constant 0 : index
      %c0_97 = arith.constant 0 : index
      %137 = vector.load %arg5[%c0_94, %c0_95, %c0_96, %c0_97] : memref<1x4x2x128xf32, #tpu.memory_space<vmem>>, vector<1x4x2x128xf32>
      %138 = vector.shape_cast %137 : vector<1x4x2x128xf32> to vector<4x2x128xf32>
      %139 = vector.shape_cast %136 : vector<4x2x128xf32> to vector<1x4x2x128xf32>
      tpu.vector_store %arg5[%c0_94, %c0_95, %c0_96, %c0_97], %139 {strides = array<i32>} : memref<1x4x2x128xf32, #tpu.memory_space<vmem>>, vector<1x4x2x128xf32>,
      %cst_98 = arith.constant 0.000000e+00 : f32
      %140 = vector.broadcast %cst_98 : f32 to vector<2x128xf32>
      %c0_99 = arith.constant 0 : index
      %c0_100 = arith.constant 0 : index
      %c0_101 = arith.constant 0 : index
      %141 = vector.load %arg6[%c0_99, %c0_100, %c0_101] : memref<1x2x128xf32, #tpu.memory_space<vmem>>, vector<1x2x128xf32>
      %142 = vector.shape_cast %141 : vector<1x2x128xf32> to vector<2x128xf32>
      %143 = vector.shape_cast %140 : vector<2x128xf32> to vector<1x2x128xf32>
      tpu.vector_store %arg6[%c0_99, %c0_100, %c0_101], %143 {strides = array<i32>} : memref<1x2x128xf32, #tpu.memory_space<vmem>>, vector<1x2x128xf32>,
    } else {
    }
    %cst = arith.constant 0.000000e+00 : f32
    %3 = vector.broadcast %cst : f32 to vector<2x128xf32>
    %c0 = arith.constant 0 : index
    %c0_1 = arith.constant 0 : index
    %c0_2 = arith.constant 0 : index
    %4 = vector.load %arg3[%c0, %c0_1, %c0_2] : memref<1x2x128xi32, #tpu.memory_space<vmem>>, vector<1x2x128xi32>
    %5 = vector.shape_cast %4 : vector<1x2x128xi32> to vector<2x128xi32>
    %c0_3 = arith.constant 0 : index
    %c0_4 = arith.constant 0 : index
    %c0_5 = arith.constant 0 : index
    %c0_6 = arith.constant 0 : index
    %6 = vector.load %arg2[%c0_3, %c0_4, %c0_5, %c0_6] : memref<1x4x2x128xf32, #tpu.memory_space<vmem>>, vector<1x1x2x128xf32>
    %7 = vector.shape_cast %6 : vector<1x1x2x128xf32> to vector<2x128xf32>
    %c0_7 = arith.constant 0 : index
    %c1 = arith.constant 1 : index
    %c0_8 = arith.constant 0 : index
    %c0_9 = arith.constant 0 : index
    %8 = vector.load %arg2[%c0_7, %c1, %c0_8, %c0_9] : memref<1x4x2x128xf32, #tpu.memory_space<vmem>>, vector<1x1x2x128xf32>
    %9 = vector.shape_cast %8 : vector<1x1x2x128xf32> to vector<2x128xf32>
    %c0_10 = arith.constant 0 : index
    %c2 = arith.constant 2 : index
    %c0_11 = arith.constant 0 : index
    %c0_12 = arith.constant 0 : index
    %10 = vector.load %arg2[%c0_10, %c2, %c0_11, %c0_12] : memref<1x4x2x128xf32, #tpu.memory_space<vmem>>, vector<1x1x2x128xf32>
    %11 = vector.shape_cast %10 : vector<1x1x2x128xf32> to vector<2x128xf32>
    %c0_13 = arith.constant 0 : index
    %c3 = arith.constant 3 : index
    %c0_14 = arith.constant 0 : index
    %c0_15 = arith.constant 0 : index
    %12 = vector.load %arg2[%c0_13, %c3, %c0_14, %c0_15] : memref<1x4x2x128xf32, #tpu.memory_space<vmem>>, vector<1x1x2x128xf32>
    %13 = vector.shape_cast %12 : vector<1x1x2x128xf32> to vector<2x128xf32>
    %14 = arith.maximumf %7, %9 : vector<2x128xf32>
    %15 = arith.maximumf %14, %11 : vector<2x128xf32>
    %16 = arith.maximumf %15, %13 : vector<2x128xf32>
    %17 = arith.subf %7, %16 : vector<2x128xf32>
    %18 = math.exp %17 : vector<2x128xf32>
    %19 = arith.subf %9, %16 : vector<2x128xf32>
    %20 = math.exp %19 : vector<2x128xf32>
    %21 = arith.subf %11, %16 : vector<2x128xf32>
    %22 = math.exp %21 : vector<2x128xf32>
    %23 = arith.subf %13, %16 : vector<2x128xf32>
    %24 = math.exp %23 : vector<2x128xf32>
    %25 = arith.addf %18, %20 : vector<2x128xf32>
    %26 = arith.addf %25, %22 : vector<2x128xf32>
    %27 = arith.addf %26, %24 : vector<2x128xf32>
    %28 = tpu.reciprocal %27 : vector<2x128xf32> -> vector<2x128xf32>
    %29 = math.log %27 : vector<2x128xf32>
    %30 = arith.addf %16, %29 : vector<2x128xf32>
    %cst_16 = arith.constant 0.000000e+00 : f32
    %31 = vector.broadcast %cst_16 : f32 to vector<2x128xf32>
    %c0_i32_17 = arith.constant 0 : i32
    %32 = vector.broadcast %c0_i32_17 : i32 to vector<2x128xi32>
    %33 = arith.cmpi eq, %5, %32 : vector<2x128xi32>
    %34 = arith.extui %33 : vector<2x128xi1> to vector<2x128xi32>
    %35 = arith.sitofp %34 : vector<2x128xi32> to vector<2x128xf32>
    %36 = arith.mulf %18, %28 : vector<2x128xf32>
    %37 = arith.mulf %36, %35 : vector<2x128xf32>
    %38 = arith.addf %3, %37 : vector<2x128xf32>
    %39 = arith.addf %36, %35 : vector<2x128xf32>
    %40 = arith.addf %3, %39 : vector<2x128xf32>
    %41 = arith.mulf %7, %35 : vector<2x128xf32>
    %42 = arith.addf %31, %41 : vector<2x128xf32>
    %c1_i32 = arith.constant 1 : i32
    %43 = vector.broadcast %c1_i32 : i32 to vector<2x128xi32>
    %44 = arith.cmpi eq, %5, %43 : vector<2x128xi32>
    %45 = arith.extui %44 : vector<2x128xi1> to vector<2x128xi32>
    %46 = arith.sitofp %45 : vector<2x128xi32> to vector<2x128xf32>
    %47 = arith.mulf %20, %28 : vector<2x128xf32>
    %48 = arith.mulf %47, %46 : vector<2x128xf32>
    %49 = arith.addf %3, %48 : vector<2x128xf32>
    %50 = arith.addf %47, %46 : vector<2x128xf32>
    %51 = arith.addf %3, %50 : vector<2x128xf32>
    %52 = arith.mulf %9, %46 : vector<2x128xf32>
    %53 = arith.addf %42, %52 : vector<2x128xf32>
    %c2_i32 = arith.constant 2 : i32
    %54 = vector.broadcast %c2_i32 : i32 to vector<2x128xi32>
    %55 = arith.cmpi eq, %5, %54 : vector<2x128xi32>
    %56 = arith.extui %55 : vector<2x128xi1> to vector<2x128xi32>
    %57 = arith.sitofp %56 : vector<2x128xi32> to vector<2x128xf32>
    %58 = arith.mulf %22, %28 : vector<2x128xf32>
    %59 = arith.mulf %58, %57 : vector<2x128xf32>
    %60 = arith.addf %3, %59 : vector<2x128xf32>
    %61 = arith.addf %58, %57 : vector<2x128xf32>
    %62 = arith.addf %3, %61 : vector<2x128xf32>
    %63 = arith.mulf %11, %57 : vector<2x128xf32>
    %64 = arith.addf %53, %63 : vector<2x128xf32>
    %c3_i32 = arith.constant 3 : i32
    %65 = vector.broadcast %c3_i32 : i32 to vector<2x128xi32>
    %66 = arith.cmpi eq, %5, %65 : vector<2x128xi32>
    %67 = arith.extui %66 : vector<2x128xi1> to vector<2x128xi32>
    %68 = arith.sitofp %67 : vector<2x128xi32> to vector<2x128xf32>
    %69 = arith.mulf %24, %28 : vector<2x128xf32>
    %70 = arith.mulf %69, %68 : vector<2x128xf32>
    %71 = arith.addf %3, %70 : vector<2x128xf32>
    %72 = arith.addf %69, %68 : vector<2x128xf32>
    %73 = arith.addf %3, %72 : vector<2x128xf32>
    %74 = arith.mulf %13, %68 : vector<2x128xf32>
    %75 = arith.addf %64, %74 : vector<2x128xf32>
    %76 = arith.subf %30, %75 : vector<2x128xf32>
    %77 = arith.addf %3, %76 : vector<2x128xf32>
    %c0_18 = arith.constant 0 : index
    %c0_19 = arith.constant 0 : index
    %c0_20 = arith.constant 0 : index
    %c0_21 = arith.constant 0 : index
    %78 = vector.load %arg4[%c0_18, %c0_19, %c0_20, %c0_21] : memref<1x4x2x128xf32, #tpu.memory_space<vmem>>, vector<1x1x2x128xf32>
    %79 = vector.shape_cast %78 : vector<1x1x2x128xf32> to vector<2x128xf32>
    %80 = arith.addf %79, %38 : vector<2x128xf32>
    %c0_22 = arith.constant 0 : index
    %c0_23 = arith.constant 0 : index
    %c0_24 = arith.constant 0 : index
    %c0_25 = arith.constant 0 : index
    %81 = vector.load %arg4[%c0_22, %c0_23, %c0_24, %c0_25] : memref<1x4x2x128xf32, #tpu.memory_space<vmem>>, vector<1x1x2x128xf32>
    %82 = vector.shape_cast %81 : vector<1x1x2x128xf32> to vector<2x128xf32>
    %83 = vector.shape_cast %80 : vector<2x128xf32> to vector<1x1x2x128xf32>
    tpu.vector_store %arg4[%c0_22, %c0_23, %c0_24, %c0_25], %83 {strides = array<i32>} : memref<1x4x2x128xf32, #tpu.memory_space<vmem>>, vector<1x1x2x128xf32>,
    %c0_26 = arith.constant 0 : index
    %c0_27 = arith.constant 0 : index
    %c0_28 = arith.constant 0 : index
    %c0_29 = arith.constant 0 : index
    %84 = vector.load %arg5[%c0_26, %c0_27, %c0_28, %c0_29] : memref<1x4x2x128xf32, #tpu.memory_space<vmem>>, vector<1x1x2x128xf32>
    %85 = vector.shape_cast %84 : vector<1x1x2x128xf32> to vector<2x128xf32>
    %86 = arith.addf %85, %40 : vector<2x128xf32>
    %c0_30 = arith.constant 0 : index
    %c0_31 = arith.constant 0 : index
    %c0_32 = arith.constant 0 : index
    %c0_33 = arith.constant 0 : index
    %87 = vector.load %arg5[%c0_30, %c0_31, %c0_32, %c0_33] : memref<1x4x2x128xf32, #tpu.memory_space<vmem>>, vector<1x1x2x128xf32>
    %88 = vector.shape_cast %87 : vector<1x1x2x128xf32> to vector<2x128xf32>
    %89 = vector.shape_cast %86 : vector<2x128xf32> to vector<1x1x2x128xf32>
    tpu.vector_store %arg5[%c0_30, %c0_31, %c0_32, %c0_33], %89 {strides = array<i32>} : memref<1x4x2x128xf32, #tpu.memory_space<vmem>>, vector<1x1x2x128xf32>,
    %c0_34 = arith.constant 0 : index
    %c1_35 = arith.constant 1 : index
    %c0_36 = arith.constant 0 : index
    %c0_37 = arith.constant 0 : index
    %90 = vector.load %arg4[%c0_34, %c1_35, %c0_36, %c0_37] : memref<1x4x2x128xf32, #tpu.memory_space<vmem>>, vector<1x1x2x128xf32>
    %91 = vector.shape_cast %90 : vector<1x1x2x128xf32> to vector<2x128xf32>
    %92 = arith.addf %91, %49 : vector<2x128xf32>
    %c0_38 = arith.constant 0 : index
    %c1_39 = arith.constant 1 : index
    %c0_40 = arith.constant 0 : index
    %c0_41 = arith.constant 0 : index
    %93 = vector.load %arg4[%c0_38, %c1_39, %c0_40, %c0_41] : memref<1x4x2x128xf32, #tpu.memory_space<vmem>>, vector<1x1x2x128xf32>
    %94 = vector.shape_cast %93 : vector<1x1x2x128xf32> to vector<2x128xf32>
    %95 = vector.shape_cast %92 : vector<2x128xf32> to vector<1x1x2x128xf32>
    tpu.vector_store %arg4[%c0_38, %c1_39, %c0_40, %c0_41], %95 {strides = array<i32>} : memref<1x4x2x128xf32, #tpu.memory_space<vmem>>, vector<1x1x2x128xf32>,
    %c0_42 = arith.constant 0 : index
    %c1_43 = arith.constant 1 : index
    %c0_44 = arith.constant 0 : index
    %c0_45 = arith.constant 0 : index
    %96 = vector.load %arg5[%c0_42, %c1_43, %c0_44, %c0_45] : memref<1x4x2x128xf32, #tpu.memory_space<vmem>>, vector<1x1x2x128xf32>
    %97 = vector.shape_cast %96 : vector<1x1x2x128xf32> to vector<2x128xf32>
    %98 = arith.addf %97, %51 : vector<2x128xf32>
    %c0_46 = arith.constant 0 : index
    %c1_47 = arith.constant 1 : index
    %c0_48 = arith.constant 0 : index
    %c0_49 = arith.constant 0 : index
    %99 = vector.load %arg5[%c0_46, %c1_47, %c0_48, %c0_49] : memref<1x4x2x128xf32, #tpu.memory_space<vmem>>, vector<1x1x2x128xf32>
    %100 = vector.shape_cast %99 : vector<1x1x2x128xf32> to vector<2x128xf32>
    %101 = vector.shape_cast %98 : vector<2x128xf32> to vector<1x1x2x128xf32>
    tpu.vector_store %arg5[%c0_46, %c1_47, %c0_48, %c0_49], %101 {strides = array<i32>} : memref<1x4x2x128xf32, #tpu.memory_space<vmem>>, vector<1x1x2x128xf32>,
    %c0_50 = arith.constant 0 : index
    %c2_51 = arith.constant 2 : index
    %c0_52 = arith.constant 0 : index
    %c0_53 = arith.constant 0 : index
    %102 = vector.load %arg4[%c0_50, %c2_51, %c0_52, %c0_53] : memref<1x4x2x128xf32, #tpu.memory_space<vmem>>, vector<1x1x2x128xf32>
    %103 = vector.shape_cast %102 : vector<1x1x2x128xf32> to vector<2x128xf32>
    %104 = arith.addf %103, %60 : vector<2x128xf32>
    %c0_54 = arith.constant 0 : index
    %c2_55 = arith.constant 2 : index
    %c0_56 = arith.constant 0 : index
    %c0_57 = arith.constant 0 : index
    %105 = vector.load %arg4[%c0_54, %c2_55, %c0_56, %c0_57] : memref<1x4x2x128xf32, #tpu.memory_space<vmem>>, vector<1x1x2x128xf32>
    %106 = vector.shape_cast %105 : vector<1x1x2x128xf32> to vector<2x128xf32>
    %107 = vector.shape_cast %104 : vector<2x128xf32> to vector<1x1x2x128xf32>
    tpu.vector_store %arg4[%c0_54, %c2_55, %c0_56, %c0_57], %107 {strides = array<i32>} : memref<1x4x2x128xf32, #tpu.memory_space<vmem>>, vector<1x1x2x128xf32>,
    %c0_58 = arith.constant 0 : index
    %c2_59 = arith.constant 2 : index
    %c0_60 = arith.constant 0 : index
    %c0_61 = arith.constant 0 : index
    %108 = vector.load %arg5[%c0_58, %c2_59, %c0_60, %c0_61] : memref<1x4x2x128xf32, #tpu.memory_space<vmem>>, vector<1x1x2x128xf32>
    %109 = vector.shape_cast %108 : vector<1x1x2x128xf32> to vector<2x128xf32>
    %110 = arith.addf %109, %62 : vector<2x128xf32>
    %c0_62 = arith.constant 0 : index
    %c2_63 = arith.constant 2 : index
    %c0_64 = arith.constant 0 : index
    %c0_65 = arith.constant 0 : index
    %111 = vector.load %arg5[%c0_62, %c2_63, %c0_64, %c0_65] : memref<1x4x2x128xf32, #tpu.memory_space<vmem>>, vector<1x1x2x128xf32>
    %112 = vector.shape_cast %111 : vector<1x1x2x128xf32> to vector<2x128xf32>
    %113 = vector.shape_cast %110 : vector<2x128xf32> to vector<1x1x2x128xf32>
    tpu.vector_store %arg5[%c0_62, %c2_63, %c0_64, %c0_65], %113 {strides = array<i32>} : memref<1x4x2x128xf32, #tpu.memory_space<vmem>>, vector<1x1x2x128xf32>,
    %c0_66 = arith.constant 0 : index
    %c3_67 = arith.constant 3 : index
    %c0_68 = arith.constant 0 : index
    %c0_69 = arith.constant 0 : index
    %114 = vector.load %arg4[%c0_66, %c3_67, %c0_68, %c0_69] : memref<1x4x2x128xf32, #tpu.memory_space<vmem>>, vector<1x1x2x128xf32>
    %115 = vector.shape_cast %114 : vector<1x1x2x128xf32> to vector<2x128xf32>
    %116 = arith.addf %115, %71 : vector<2x128xf32>
    %c0_70 = arith.constant 0 : index
    %c3_71 = arith.constant 3 : index
    %c0_72 = arith.constant 0 : index
    %c0_73 = arith.constant 0 : index
    %117 = vector.load %arg4[%c0_70, %c3_71, %c0_72, %c0_73] : memref<1x4x2x128xf32, #tpu.memory_space<vmem>>, vector<1x1x2x128xf32>
    %118 = vector.shape_cast %117 : vector<1x1x2x128xf32> to vector<2x128xf32>
    %119 = vector.shape_cast %116 : vector<2x128xf32> to vector<1x1x2x128xf32>
    tpu.vector_store %arg4[%c0_70, %c3_71, %c0_72, %c0_73], %119 {strides = array<i32>} : memref<1x4x2x128xf32, #tpu.memory_space<vmem>>, vector<1x1x2x128xf32>,
    %c0_74 = arith.constant 0 : index
    %c3_75 = arith.constant 3 : index
    %c0_76 = arith.constant 0 : index
    %c0_77 = arith.constant 0 : index
    %120 = vector.load %arg5[%c0_74, %c3_75, %c0_76, %c0_77] : memref<1x4x2x128xf32, #tpu.memory_space<vmem>>, vector<1x1x2x128xf32>
    %121 = vector.shape_cast %120 : vector<1x1x2x128xf32> to vector<2x128xf32>
    %122 = arith.addf %121, %73 : vector<2x128xf32>
    %c0_78 = arith.constant 0 : index
    %c3_79 = arith.constant 3 : index
    %c0_80 = arith.constant 0 : index
    %c0_81 = arith.constant 0 : index
    %123 = vector.load %arg5[%c0_78, %c3_79, %c0_80, %c0_81] : memref<1x4x2x128xf32, #tpu.memory_space<vmem>>, vector<1x1x2x128xf32>
    %124 = vector.shape_cast %123 : vector<1x1x2x128xf32> to vector<2x128xf32>
    %125 = vector.shape_cast %122 : vector<2x128xf32> to vector<1x1x2x128xf32>
    tpu.vector_store %arg5[%c0_78, %c3_79, %c0_80, %c0_81], %125 {strides = array<i32>} : memref<1x4x2x128xf32, #tpu.memory_space<vmem>>, vector<1x1x2x128xf32>,
    %c0_82 = arith.constant 0 : index
    %c0_83 = arith.constant 0 : index
    %c0_84 = arith.constant 0 : index
    %126 = vector.load %arg6[%c0_82, %c0_83, %c0_84] : memref<1x2x128xf32, #tpu.memory_space<vmem>>, vector<1x2x128xf32>
    %127 = vector.shape_cast %126 : vector<1x2x128xf32> to vector<2x128xf32>
    %128 = arith.addf %127, %77 : vector<2x128xf32>
    %c0_85 = arith.constant 0 : index
    %c0_86 = arith.constant 0 : index
    %c0_87 = arith.constant 0 : index
    %129 = vector.load %arg6[%c0_85, %c0_86, %c0_87] : memref<1x2x128xf32, #tpu.memory_space<vmem>>, vector<1x2x128xf32>
    %130 = vector.shape_cast %129 : vector<1x2x128xf32> to vector<2x128xf32>
    %131 = vector.shape_cast %128 : vector<2x128xf32> to vector<1x2x128xf32>
    tpu.vector_store %arg6[%c0_85, %c0_86, %c0_87], %131 {strides = array<i32>} : memref<1x2x128xf32, #tpu.memory_space<vmem>>, vector<1x2x128xf32>,
    return
  }
  func.func @transform_0(%arg0: i32, %arg1: i32) -> (i32, i32, i32, i32) {
    %c0_i32 = arith.constant 0 : i32
    %c0_i32_0 = arith.constant 0 : i32
    %c0_i32_1 = arith.constant 0 : i32
    return %arg0, %c0_i32, %arg1, %c0_i32_0 : i32, i32, i32, i32
  }
  func.func @transform_1(%arg0: i32, %arg1: i32) -> (i32, i32, i32) {
    %c0_i32 = arith.constant 0 : i32
    %c0_i32_0 = arith.constant 0 : i32
    return %arg0, %arg1, %c0_i32 : i32, i32, i32
  }
  func.func @transform_2(%arg0: i32, %arg1: i32) -> (i32, i32, i32, i32) {
    %c0_i32 = arith.constant 0 : i32
    %c0_i32_0 = arith.constant 0 : i32
    %c0_i32_1 = arith.constant 0 : i32
    %c0_i32_2 = arith.constant 0 : i32
    return %arg0, %c0_i32, %c0_i32_0, %c0_i32_1 : i32, i32, i32, i32
  }
  func.func @transform_3(%arg0: i32, %arg1: i32) -> (i32, i32, i32, i32) {
    %c0_i32 = arith.constant 0 : i32
    %c0_i32_0 = arith.constant 0 : i32
    %c0_i32_1 = arith.constant 0 : i32
    %c0_i32_2 = arith.constant 0 : i32
    return %arg0, %c0_i32, %c0_i32_0, %c0_i32_1 : i32, i32, i32, i32
  }
  func.func @transform_4(%arg0: i32, %arg1: i32) -> (i32, i32, i32) {
    %c0_i32 = arith.constant 0 : i32
    %c0_i32_0 = arith.constant 0 : i32
    %c0_i32_1 = arith.constant 0 : i32
    return %arg0, %c0_i32, %c0_i32_0 : i32, i32, i32
  }
}

</mosaic_0001>

<bundles_post_ra>
// kernel: tpu_custom_call.1
= control target key start
LH: loop header
LB: loop body
LE: loop exit
PB: predicated region body
PF: predicated region fallthrough
CT: control target
= control target key end

     0   :  { %s1297_s0 = inlined_call_operand.hbm [shape: f32[2,4,2,128], index: 0, kind: input, shape index: {}]   ;;  %s1298_s1 = inlined_call_operand.hbm [shape: s32[2,2,128], index: 1, kind: input, shape index: {}]   ;;  %s1299_s2 = inlined_call_operand.hbm [shape: f32[2,4,2,128], index: 2, kind: output, shape index: {0}]   ;;  %s1300_s3 = inlined_call_operand.hbm [shape: f32[2,4,2,128], index: 3, kind: output, shape index: {1}]   ;;  %s1301_s4 = inlined_call_operand.hbm [shape: f32[2,2,128], index: 4, kind: output, shape index: {2}]  }
   0x1   :  { %1304 = sst [smem:[#allocation17_spill]] %s1297_s0 }
   0x2   :  { %10 = vsyncpa [#allocation3], 0 }
   0x3   :  { %12 = vsyncpa [#allocation3 + $0x1], 0 }
   0x4   :  { %13 = vsyncpa [#allocation6], 0 }
   0x5   :  { %15 = vsyncpa [#allocation6 + $0x1], 0 }
   0x6   :  { %16 = vsyncpa [#allocation4], 0 }
   0x7   :  { %18 = vsyncpa [#allocation4 + $0x1], 0 }
   0x8   :  { %19 = vsyncpa [#allocation9], 0 }
   0x9   :  { %21 = vsyncpa [#allocation9 + $0x1], 0  ;;  %s1002_s15 = smov 0   ;;  %s1004_s16 = smov 0  }
   0xa   :  { %s1006_s17 = smov 0   ;;  %s1008_s18 = smov 0  }
   0xb   :  { %s1010_s19 = smov 0   ;;  %s1012_s20 = smov 0  }
   0xc LB: > { %s1033_s21 = sadd.s32 4294967295, %s965_s20   ;;  %s1302_s22 = sadd.s32 4294967294, %s965_s20   ;;  %s965_s20 = sphi %s1012_s20, %s27_s20   ;;  %s961_s19 = sphi %s1010_s19, %s1322_s19   ;;  %s957_s18 = sphi %s1008_s18, %s1321_s18   ;;  %s953_s17 = sphi %s1006_s17, %s1320_s17   ;;  %s949_s16 = sphi %s1004_s16, %s1319_s16   ;;  %s945_s15 = sphi %s1002_s15, %s1318_s15  }
   0xd   : > { %s39_s23 = sadd.s32 1, %s961_s19  ;;  %s48_s24 = sadd.s32 1, %s953_s17 }
   0xe   : > { %p41_p0 = scmp.ge.s32.totalorder %s39_s23, 2  ;;  %p55_p1 = scmp.ne.s32.totalorder %s953_s17, %s949_s16 }
   0xf   : > { %p56_p2 = scmp.eq.s32.totalorder %s965_s20, 0  ;;  %p61_p3 = scmp.ne.s32.totalorder %s949_s16, %s945_s15 }
  0x10   : > { %s1324_s23 = smov (%p41_p0, %s39_s23), 0  ;;  %p62_p5 = scmp.eq.s32.totalorder %s1033_s21, 0 }
  0x11   : > { %1305 = sst [smem:[#allocation15_spill]] %s1324_s23  ;;  %p1045_p4 = por %p56_p2, %p55_p1 }
  0x12   : > { %s43_s26 = ssub.s32 %s961_s19, %s1324_s23  ;;  %p113_p6 = scmp.eq.s32.totalorder %s1033_s21, 1 }
  0x13   : > { %p46_p7 = scmp.eq.s32.totalorder %s43_s26, 0  ;;  %p1053_p8 = por %p62_p5, %p61_p3 }
  0x14   : > { %p1057_p9 = por %p113_p6, %p55_p1  ;;  %p119_p10 = scmp.eq.s32.totalorder %s1302_s22, 1 }
  0x15   : > { %s1064_s29 = scalar_select %p46_p7, %s953_s17, %s48_s24  }
  0x16   : > { %p1066_p11 = por %p119_p10, %p61_p3  ;;  %p702_p13 = scmp.lt.s32.totalorder %s965_s20, 2 }
  0x17   : > { %1309 = sst [smem:[#allocation16_spill]] %s1064_s29  ;;  %s1073_s5 = sand.u32 1, %s953_s17  }
  0x18   : > { %s632_s6 = sshll.u32 %s1073_s5, 3  ;;  %s672_s7 = sshll.u32 %s961_s19, 7 }
  0x19   : > { %s1311_s0 = sld [smem:[#allocation17_spill]]  ;;  %s195_s11 = scalar_lea.vmem [#allocation2], %s632_s6 }
  0x1a   : > { %s203_s12 = sshll.u32 %s195_s11, 4  ;;  %p1082_p0 = pnand %p702_p13, %p1045_p4  ;;  %s204_s12 = int_to_ptr.vmem [resolvable:$true] %s203_s12 }
  0x1b   : > { %p637_p1 = scmp.ge.s32.totalorder %s965_s20, 1  ;;  %s192_s14 = scalar_lea.sflag [#allocation3], %s1073_s5 }
  0x1c   : > { %p771_p2 = pneg %p1082_p0  ;;  %s782_s24 = scalar_lea.vmem %s204_s12, 128 }
  0x1d   : > { %p783_p3 = scmp.ne.s32.totalorder %s204_s12, %s782_s24  ;;  %s967_s26 = smov [#allocation2]  }
  0x1e   : > { %s787_s6 = sshll.u32 %s967_s26, 4  ;;  %s788_s6 = int_to_ptr.vmem [resolvable:$false] %s787_s6 }
  0x1f   : > { %s202_s10 = scalar_lea.hbm %s1311_s0, %s672_s7  ;;  %p785_p5 = pnand %p783_p3, %p771_p2 }
  0x20   : > { %s789_s25 = scalar_lea.vmem %s788_s6, 256  ;;  %p790_p4 = scmp.lt.s32.totalorder %s204_s12, %s788_s6 }
  0x21   : > { %p786_p6 = pneg %p785_p5  ;;  %p791_p7 = scmp.lt.s32.totalorder %s789_s25, %s782_s24 }
  0x23   : > { %p792_p10 = por %p791_p7, %p790_p4 }
  0x25   : > { %p793_p13 = pnand %p792_p10, %p786_p6 }
  0x27   : > { %796 = shalt.err (!%p793_p13)
}
  0x28   : > { %s968_s7 = smov 32   ;;  %s969_s8 = smov 2  }
  0x29   : > { %688 = dma.hbm_to_vmem [thread:$0]  (!%p1082_p0), %s202_s10, 128, %s204_s12, %s192_s14, %s968_s7, %s968_s7, %s969_s8  }
  0x2a   : > { %p230_p3 = scmp.lt.s32.totalorder %s965_s20, 3  ;;  %s635_s9 = sshll.u32 %s1073_s5, 1 }
  0x2b   : > { %s636_s11 = sshll.u32 %s961_s19, 5  ;;  %s217_s22 = scalar_lea.vmem [#allocation5], %s635_s9 }
  0x2c   : > { %p1100_p5 = pnand %p637_p1, %p230_p3  ;;  %s223_s25 = scalar_lea.hbm %s1298_s1, %s636_s11 }
  0x2d   : > { %s225_s0 = sshll.u32 %s217_s22, 4  ;;  %s214_s23 = scalar_lea.sflag [#allocation6], %s1073_s5  ;;  %s226_s0 = int_to_ptr.vmem [resolvable:$true] %s225_s0 }
  0x2e   : > { %s810_s29 = scalar_lea.vmem %s226_s0, 32  ;;  %s970_s10 = smov [#allocation5]  }
  0x2f   : > { %p811_p6 = scmp.ne.s32.totalorder %s226_s0, %s810_s29  ;;  %s815_s12 = sshll.u32 %s970_s10, 4  ;;  %s816_s12 = int_to_ptr.vmem [resolvable:$false] %s815_s12 }
  0x30   : > { %s817_s14 = scalar_lea.vmem %s816_s12, 64  ;;  %p818_p1 = scmp.lt.s32.totalorder %s226_s0, %s816_s12 }
  0x31   : > { %p813_p4 = pnand %p811_p6, %p771_p2  ;;  %p819_p10 = scmp.lt.s32.totalorder %s817_s14, %s810_s29 }
  0x33   : > { %p814_p7 = pneg %p813_p4  ;;  %p820_p13 = por %p819_p10, %p818_p1 }
  0x35   : > { %p821_p3 = pnand %p820_p13, %p814_p7 }
  0x37   : > { %824 = shalt.err (!%p821_p3)
}
  0x38   : > { %691 = dma.hbm_to_vmem [thread:$0]  (!%p1082_p0), %s223_s25, 32, %s226_s0, %s214_s23  }
  0x39   : > { %234 = sbr.rel (%p1100_p5) target bundleno = 184 (0xb8), region = 28  ;;  %s1116_s22 = sand.u32 (!%p1100_p5), 1, %s949_s16  }
  0x3a   : > { %s638_s5 = sshll.u32 (!%p1100_p5), %s1116_s22, 3  ;;  %s237_s7 = scalar_lea.sflag (!%p1100_p5), [#allocation3], %s1116_s22 }
  0x3b   : > { %s240_s8 = scalar_lea.vmem (!%p1100_p5), [#allocation2], %s638_s5 }
  0x3e   : > { %928 = dma.done.wait (%p1053_p8), %s237_s7, 128  }
  0x3f   : > { %930 = vsyncadd (%p1053_p8), %s237_s7, 4294967168  ;;  %s639_s0 = sshll.u32 %s1116_s22, 1  ;;  %s246_s23 = scalar_lea.sflag [#allocation6], %s1116_s22 }
  0x40   : > { %s1126_s29 = scalar_lea.vmem [#allocation5], %s639_s0 }
  0x41   : > { %932 = dma.done.wait (%p1053_p8), %s246_s23, 32  }
  0x42   : > { %934 = vsyncadd (%p1053_p8), %s246_s23, 4294967264  ;;  %s1132_s13 = scalar_lea.vmem [#allocation8], %s638_s5  ;;  %v971_v0 = vmov 0.0   ;;  %s1138_s9 = scalar_lea.vmem [#allocation7], %s638_s5  ;;  %v303_v1 = vld [vmem:[%s240_s8] sm:$0x3] }
  0x43   : > { %297 = vst [vmem:[%s1132_s13] sm:$0x3] %v971_v0  ;;  %298 = vst [vmem:[%s1132_s13 + $0x2] sm:$0x3] %v971_v0  ;;  %s1144_s27 = scalar_lea.vmem [#allocation10], %s639_s0  ;;  %v643_v2 = vld [vmem:[%s240_s8 + $0x2] sm:$0x3] }
  0x44   : > { %299 = vst [vmem:[%s1132_s13 + $0x4] sm:$0x3] %v971_v0  ;;  %300 = vst [vmem:[%s1132_s13 + $0x6] sm:$0x3] %v971_v0  ;;  %v644_v3 = vld [vmem:[%s240_s8 + $0x4] sm:$0x3]  ;;  %v310_v4 = vmax.f32 %v303_v1, %v643_v2 }
  0x45   : > { %293 = vst [vmem:[%s1138_s9] sm:$0x3] %v971_v0  ;;  %294 = vst [vmem:[%s1138_s9 + $0x2] sm:$0x3] %v971_v0  ;;  %v645_v5 = vld [vmem:[%s240_s8 + $0x6] sm:$0x3]  ;;  %s412_s11 = sand.u32 1, %s1033_s21  }
  0x46   : > { %295 = vst [vmem:[%s1138_s9 + $0x4] sm:$0x3] %v971_v0  ;;  %296 = vst [vmem:[%s1138_s9 + $0x6] sm:$0x3] %v971_v0  ;;  %v311_v6 = vmax.f32 %v310_v4, %v644_v3  ;;  %v302_v19 = vld [vmem:[%s1126_s29] sm:$0x3] }
  0x47   : > { %301 = vst [vmem:[%s1144_s27] sm:$0x3] %v971_v0  ;;  %vm332_vm0 = vcmp.eq.s32.totalorder %v302_v19, 0  ;;  %vm342_vm1 = vcmp.eq.s32.totalorder %v302_v19, 1  ;;  %vm352_vm2 = vcmp.eq.s32.totalorder %v302_v19, 2  ;;  %vm362_vm3 = vcmp.eq.s32.totalorder %v302_v19, 3  ;;  %s673_s24 = sshll.u32 %s957_s18, 7 }
  0x48   : > { %v1147_v7 = vmax.f32 %v311_v6, %v645_v5  ;;  %v646_v24 = vsel %vm332_vm0, 1.0, %v971_v0  ;;  %v647_v25 = vsel %vm342_vm1, 1.0, %v971_v0  ;;  %v648_v28 = vsel %vm352_vm2, 1.0, %v971_v0  ;;  %s447_s26 = sshll.u32 %s1132_s13, 4  ;;  %s431_s6 = sshll.u32 %s1138_s9, 4  ;;  %s1175_s26 = int_to_ptr.vmem [resolvable:$true] %s447_s26  ;;  %s1184_s6 = int_to_ptr.vmem [resolvable:$true] %s431_s6 }
  0x49   : > { %v340_v26 = vmul.f32 %v646_v24, %v303_v1  ;;  %v350_v27 = vmul.f32 %v647_v25, %v643_v2  ;;  %v360_v29 = vmul.f32 %v648_v28, %v644_v3  ;;  %v649_v31 = vsel %vm362_vm3, 1.0, %v971_v0  ;;  %s1173_s12 = scalar_lea.hbm %s1300_s3, %s673_s24  ;;  %s1182_s7 = scalar_lea.hbm %s1299_s2, %s673_s24 }
  0x4a   : > { %v313_v8 = vsub.f32 %v303_v1, %v1147_v7  ;;  %v316_v9 = vsub.f32 %v643_v2, %v1147_v7  ;;  %v319_v10 = vsub.f32 %v644_v3, %v1147_v7  ;;  %v322_v11 = vsub.f32 %v645_v5, %v1147_v7  ;;  %v377_v35 = vld [vmem:[%s1132_s13] sm:$0x3]  ;;  %v652_v39 = vld [vmem:[%s1132_s13 + $0x2] sm:$0x3]  ;;  %s463_s8 = sshll.u32 %s1144_s27, 4  ;;  %s669_s0 = sshll.u32 %s957_s18, 5  ;;  %s464_s8 = int_to_ptr.vmem [resolvable:$true] %s463_s8 }
  0x4b   : > { %v351_v30 = vadd.f32 %v350_v27, %v340_v26  ;;  %v370_v33 = vmul.f32 %v649_v31, %v645_v5  ;;  %v656_v41 = vld [vmem:[%s1132_s13 + $0x4] sm:$0x3]  ;;  %v660_v43 = vld [vmem:[%s1132_s13 + $0x6] sm:$0x3]  ;;  %s1200_s23 = scalar_lea.sflag [#allocation9], %s412_s11  ;;  %s825_s29 = scalar_lea.vmem %s1175_s26, 128 }
  0x4c   : > { %v314_v12 = vmul.f32 1.442695, %v313_v8  ;;  %v317_v13 = vmul.f32 1.442695, %v316_v9  ;;  %v320_v14 = vmul.f32 1.442695, %v319_v10  ;;  %p826_p8 = scmp.ne.s32.totalorder %s1175_s26, %s825_s29 }
  0x4d   : > { %v323_v15 = vmul.f32 1.442695, %v322_v11  ;;  %v361_v32 = vadd.f32 %v360_v29, %v351_v30  ;;  %v374_v44 = vld [vmem:[%s1138_s9] sm:$0x3]  ;;  %v650_v51 = vld [vmem:[%s1138_s9 + $0x2] sm:$0x3] }
  0x4e   : > { %757 = vpow2.f32 %v314_v12  ;;  %v654_v52 = vld [vmem:[%s1138_s9 + $0x4] sm:$0x3]  ;;  %v658_v53 = vld [vmem:[%s1138_s9 + $0x6] sm:$0x3]  ;;  %v404_v3 = vld [vmem:[%s1144_s27] sm:$0x3]  ;;  %p827_p0 = pnand %p826_p8, %p1057_p9 }
  0x4f   : > { %759 = vpow2.f32 %v317_v13  ;;  %v1161_v46 = vadd.f32 %v370_v33, %v361_v32  ;;  %s972_s24 = smov [#allocation8]  }
  0x50   : > { %761 = vpow2.f32 %v320_v14  ;;  %p828_p2 = pneg %p827_p0  ;;  %s829_s25 = sshll.u32 %s972_s24, 4  ;;  %s830_s25 = int_to_ptr.vmem [resolvable:$false] %s829_s25 }
  0x51   : > { %763 = vpow2.f32 %v323_v15  ;;  %p832_p5 = scmp.lt.s32.totalorder %s1175_s26, %s830_s25 }
  0x5b   : > { %v758_v16 = vpop.eup %757 }
  0x5c   : > { %v760_v17 = vpop.eup %759 }
  0x5d   : > { %v762_v18 = vpop.eup %761  ;;  %v325_v20 = vadd.f32 %v760_v17, %v758_v16 }
  0x5e   : > { %v764_v21 = vpop.eup %763 }
  0x5f   : > { %v326_v22 = vadd.f32 %v762_v18, %v325_v20 }
  0x61   : > { %v327_v23 = vadd.f32 %v764_v21, %v326_v22 }
  0x63   : > { %765 = vrcp.f32 %v327_v23 }
  0x64   : > { %767 = vlog2.f32 %v327_v23 }
  0x70   : > { %v766_v34 = vpop.eup %765 }
  0x71   : > { %v768_v36 = vpop.eup %767  ;;  %v335_v37 = vmul.f32 %v766_v34, %v758_v16  ;;  %v345_v38 = vmul.f32 %v766_v34, %v760_v17  ;;  %v355_v40 = vmul.f32 %v766_v34, %v762_v18  ;;  %v365_v42 = vmul.f32 %v766_v34, %v764_v21 }
  0x72   : > { %v330_v45 = vmul.f32 0.6931472, %v768_v36 }
  0x73   : > { %v338_v47 = vadd.f32 %v646_v24, %v335_v37  ;;  %v348_v48 = vadd.f32 %v647_v25, %v345_v38  ;;  %v358_v49 = vadd.f32 %v648_v28, %v355_v40  ;;  %v368_v50 = vadd.f32 %v649_v31, %v365_v42 }
  0x74   : > { %v336_v54 = vmul.f32 %v646_v24, %v335_v37  ;;  %v346_v55 = vmul.f32 %v647_v25, %v345_v38  ;;  %v356_v56 = vmul.f32 %v648_v28, %v355_v40  ;;  %v366_v57 = vmul.f32 %v649_v31, %v365_v42 }
  0x75   : > { %v378_v58 = vadd.f32 %v377_v35, %v338_v47  ;;  %v386_v59 = vadd.f32 %v652_v39, %v348_v48  ;;  %v394_v60 = vadd.f32 %v656_v41, %v358_v49  ;;  %v402_v61 = vadd.f32 %v660_v43, %v368_v50 }
  0x76   : > { %v375_v62 = vadd.f32 %v374_v44, %v336_v54  ;;  %v382_v63 = vadd.f32 %v650_v51, %v346_v55  ;;  %v390_v0 = vadd.f32 %v654_v52, %v356_v56  ;;  %v398_v1 = vadd.f32 %v658_v53, %v366_v57 }
  0x77   : > { %379 = vst [vmem:[%s1132_s13] sm:$0x3] %v378_v58  ;;  %653 = vst [vmem:[%s1132_s13 + $0x2] sm:$0x3] %v386_v59  ;;  %v331_v2 = vadd.f32 %v330_v45, %v1147_v7 }
  0x78   : > { %657 = vst [vmem:[%s1132_s13 + $0x4] sm:$0x3] %v394_v60  ;;  %661 = vst [vmem:[%s1132_s13 + $0x6] sm:$0x3] %v402_v61  ;;  %s831_s13 = scalar_lea.vmem %s830_s25, 256 }
  0x79   : > { %376 = vst [vmem:[%s1138_s9] sm:$0x3] %v375_v62  ;;  %651 = vst [vmem:[%s1138_s9 + $0x2] sm:$0x3] %v382_v63  ;;  %p833_p6 = scmp.lt.s32.totalorder %s831_s13, %s825_s29 }
  0x7a   : > { %655 = vst [vmem:[%s1138_s9 + $0x4] sm:$0x3] %v390_v0  ;;  %659 = vst [vmem:[%s1138_s9 + $0x6] sm:$0x3] %v398_v1 }
  0x7b   : > { %p834_p4 = por %p833_p6, %p832_p5 }
  0x7d   : > { %p835_p7 = pnand %p834_p4, %p828_p2 }
  0x7f   : > { %838 = shalt.err (!%p835_p7)
}
  0x80   : > { %s839_s21 = scalar_lea.hbm %s1173_s12, 128  ;;  %s843_s10 = scalar_lea.hbm %s1300_s3, 256 }
  0x81   : > { %p840_p1 = scmp.ne.s32.totalorder %s1173_s12, %s839_s21  ;;  %p844_p3 = scmp.lt.s32.totalorder %s1173_s12, %s1300_s3 }
  0x82   : > { %p845_p8 = scmp.lt.s32.totalorder %s843_s10, %s839_s21 }
  0x83   : > { %p841_p10 = pnand %p840_p1, %p1057_p9 }
  0x84   : > { %p846_p0 = por %p845_p8, %p844_p3 }
  0x85   : > { %p842_p13 = pneg %p841_p10 }
  0x87   : > { %p847_p2 = pnand %p846_p0, %p842_p13 }
  0x89   : > { %850 = shalt.err (!%p847_p2)
}
  0x8a   : > { %s973_s29 = smov 32   ;;  %s974_s24 = smov 2   ;;  %v372_v4 = vsub.f32 %v331_v2, %v1161_v46 }
  0x8b   : > { %680 = dma.vmem_to_hbm [thread:$0]  (%p1057_p9), %s1175_s26, 128, %s1173_s12, %s1200_s23, %s973_s29, %s973_s29, %s974_s24  }
  0x8c   : > { %s408_s25 = scalar_lea.sflag [#allocation4], %s1116_s22  ;;  %s851_s13 = scalar_lea.vmem %s1184_s6, 128 }
  0x8d   : > { %p852_p5 = scmp.ne.s32.totalorder %s1184_s6, %s851_s13  ;;  %s975_s21 = smov [#allocation7]  }
  0x8e   : > { %s855_s9 = sshll.u32 %s975_s21, 4  ;;  %s856_s9 = int_to_ptr.vmem [resolvable:$false] %s855_s9 }
  0x8f   : > { %p853_p6 = pnand %p852_p5, %p1057_p9  ;;  %s857_s11 = scalar_lea.vmem %s856_s9, 256 }
  0x90   : > { %p858_p7 = scmp.lt.s32.totalorder %s1184_s6, %s856_s9  ;;  %p859_p1 = scmp.lt.s32.totalorder %s857_s11, %s851_s13 }
  0x91   : > { %p854_p4 = pneg %p853_p6 }
  0x92   : > { %p860_p10 = por %p859_p1, %p858_p7 }
  0x94   : > { %p861_p13 = pnand %p860_p10, %p854_p4 }
  0x96   : > { %864 = shalt.err (!%p861_p13)
}
  0x97   : > { %s865_s26 = scalar_lea.hbm %s1182_s7, 128  ;;  %s869_s10 = scalar_lea.hbm %s1299_s2, 256 }
  0x98   : > { %p866_p3 = scmp.ne.s32.totalorder %s1182_s7, %s865_s26  ;;  %p870_p2 = scmp.lt.s32.totalorder %s1182_s7, %s1299_s2 }
  0x99   : > { %p871_p5 = scmp.lt.s32.totalorder %s869_s10, %s865_s26 }
  0x9a   : > { %p867_p8 = pnand %p866_p3, %p1057_p9 }
  0x9b   : > { %p872_p6 = por %p871_p5, %p870_p2 }
  0x9c   : > { %p868_p0 = pneg %p867_p8 }
  0x9e   : > { %p873_p4 = pnand %p872_p6, %p868_p0 }
  0xa0   : > { %876 = shalt.err (!%p873_p4)
}
  0xa1   : > { %679 = dma.vmem_to_hbm [thread:$0]  (%p1057_p9), %s1184_s6, 128, %s1182_s7, %s408_s25, %s973_s29, %s973_s29, %s974_s24   ;;  %v405_v5 = vadd.f32 %v404_v3, %v372_v4 }
  0xa2   : > { %s461_s9 = scalar_lea.hbm %s1301_s4, %s669_s0  ;;  %s877_s11 = scalar_lea.vmem %s464_s8, 32 }
  0xa3   : > { %406 = vst [vmem:[%s1144_s27] sm:$0x3] %v405_v5  ;;  %p878_p7 = scmp.ne.s32.totalorder %s464_s8, %s877_s11  ;;  %s976_s26 = smov [#allocation10]  }
  0xa4   : > { %s881_s22 = sshll.u32 %s976_s26, 4  ;;  %s882_s22 = int_to_ptr.vmem [resolvable:$false] %s881_s22 }
  0xa5   : > { %p879_p1 = pnand %p878_p7, %p1057_p9  ;;  %s883_s12 = scalar_lea.vmem %s882_s22, 64 }
  0xa6   : > { %p884_p13 = scmp.lt.s32.totalorder %s464_s8, %s882_s22  ;;  %p885_p3 = scmp.lt.s32.totalorder %s883_s12, %s877_s11 }
  0xa7   : > { %p880_p10 = pneg %p879_p1 }
  0xa8   : > { %p886_p8 = por %p885_p3, %p884_p13 }
  0xaa   : > { %p887_p0 = pnand %p886_p8, %p880_p10 }
  0xac   : > { %890 = shalt.err (!%p887_p0)
}
  0xad   : > { %s891_s18 = scalar_lea.hbm %s461_s9, 32  ;;  %s895_s7 = scalar_lea.hbm %s1301_s4, 64 }
  0xae   : > { %p892_p2 = scmp.ne.s32.totalorder %s461_s9, %s891_s18  ;;  %p896_p4 = scmp.lt.s32.totalorder %s461_s9, %s1301_s4 }
  0xaf   : > { %p897_p7 = scmp.lt.s32.totalorder %s895_s7, %s891_s18 }
  0xb0   : > { %p893_p5 = pnand %p892_p2, %p1057_p9 }
  0xb1   : > { %p898_p1 = por %p897_p7, %p896_p4 }
  0xb2   : > { %p894_p6 = pneg %p893_p5 }
  0xb4   : > { %p899_p12 = pnand %p898_p1, %p894_p6 }
  0xb6   : > { %902 = shalt.err (!%p899_p12)
}
  0xb7   : > { %681 = dma.vmem_to_hbm [thread:$0]  (%p1057_p9), %s464_s8, 32, %s461_s9, %s1200_s23  }
  0xb8 PF: > { %s475_s24 = sand.u32 1, %s945_s15   ;;  %p1314_p10 = scmp.ge.s32.totalorder %s965_s20, 2 }
  0xb9   : > { %s476_s25 = scalar_lea.sflag [#allocation4], %s475_s24 }
  0xba   : > { %p693_p13 = pnand %p1314_p10, %p1066_p11 }
  0xbc   : > { %p694_p3 = pneg %p693_p13 }
  0xbe   : > { %936 = dma.done.wait (%p694_p3), %s476_s25, 128  }
  0xbf   : > { %938 = vsyncadd (%p694_p3), %s476_s25, 4294967168  ;;  %s1315_s10 = sadd.s32 4294967294, %s965_s20  }
  0xc0   : > { %s484_s14 = sand.u32 1, %s1315_s10  }
  0xc1   : > { %s485_s5 = scalar_lea.sflag [#allocation9], %s484_s14 }
  0xc2   : > { %940 = dma.done.wait (%p694_p3), %s485_s5, 160  }
  0xc3   : > { %942 = vsyncadd (%p694_p3), %s485_s5, 4294967136  ;;  %s27_s20 = sadd.s32 1, %s965_s20   ;;  %s1316_s28 = sld [smem:[#allocation16_spill]] }
  0xc4   : > { %p24_p9 = scmp.ge.s32.totalorder %s27_s20, 4   ;;  %s1317_s30 = sld [smem:[#allocation15_spill]] }
  0xc5   : > { %s1318_s15 = smov %s949_s16  ;;  %s1319_s16 = smov %s953_s17 }
  0xc6   : > { %s1321_s18 = smov %s961_s19  ;;  %26 = sbr.rel (!%p24_p9) target bundleno = 12 (0xc), region = 131 }
  0xc9   : > { %s1320_s17 = smov %s1316_s28 }
  0xca   : > { %s1322_s19 = smov %s1317_s30 }
  0xcb   :  { %499 = vsyncpa [#allocation3], 1 }
  0xcc   :  { %501 = vsyncpa [#allocation3 + $0x1], 1 }
  0xcd   :  { %502 = vsyncpa [#allocation6], 1 }
  0xce   :  { %504 = vsyncpa [#allocation6 + $0x1], 1 }
  0xcf   :  { %505 = vsyncpa [#allocation4], 1 }
  0xd0   :  { %507 = vsyncpa [#allocation4 + $0x1], 1 }
  0xd1   :  { %508 = vsyncpa [#allocation9], 1 }
  0xd2   :  { %510 = vsyncpa [#allocation9 + $0x1], 1 }

</bundles_post_ra>
